<compile_context>
chip_gen: v6e
topology: v6e:2x2x1
jax: 0.10.0
libtpu: 0.0.40
codegen_flags: <defaults>
</compile_context>

<pallas_src>
import functools

import jax
import jax.numpy as jnp
from jax.experimental import pallas as pl
from jax.experimental.pallas import tpu as pltpu


# --------------------------------------------------------------------------
# Kernel
# --------------------------------------------------------------------------
def combined_kernel(img_ref, txt_ref,
                    w1a_ref, w1b_ref, b1_ref,
                    w2_ref, b2_ref,
                    w3_ref, b3_ref,
                    out_ref,
                    img_acc, txt_acc,
                    *, inv_s_img, inv_s_txt,
                    s_img, s_txt, ck_img, ck_txt,
                    mask_img, mask_txt):
    k = pl.program_id(1)
    nk = pl.num_programs(1)

    # ---- init pooled-sum accumulators at the first seq chunk ---------------
    @pl.when(k == 0)
    def _():
        img_acc[...] = jnp.zeros_like(img_acc)
        txt_acc[...] = jnp.zeros_like(txt_acc)

    # ---- accumulate per-modality sequence sums (f32 accumulation, bf16 in) -
    img_chunk = img_ref[...]                                  # (TB, CK_i, H_i)
    if mask_img:   # partial / beyond-last seq chunk (static Python condition)
        seq_idx = jax.lax.broadcasted_iota(jnp.int32,
                                           (ck_img, img_chunk.shape[-1]), 0)
        valid = seq_idx < (s_img - k * ck_img)
        img_chunk = jnp.where(valid[None, :, :], img_chunk, 0)
    img_acc[...] += jnp.sum(img_chunk, axis=1, dtype=jnp.float32)

    txt_chunk = txt_ref[...]                                  # (TB, CK_t, H_t)
    if mask_txt:
        seq_idx = jax.lax.broadcasted_iota(jnp.int32,
                                           (ck_txt, txt_chunk.shape[-1]), 0)
        valid = seq_idx < (s_txt - k * ck_txt)
        txt_chunk = jnp.where(valid[None, :, :], txt_chunk, 0)
    txt_acc[...] += jnp.sum(txt_chunk, axis=1, dtype=jnp.float32)

    # ---- finalize: mean -> concat -> MLP head, only on the last seq chunk --
    @pl.when(k == nk - 1)
    def _():
        img_mean = img_acc[...] * inv_s_img
        txt_mean = txt_acc[...] * inv_s_txt

        # concat(a, b) @ W1 == a @ W1[:H_img] + b @ W1[H_img:]  (W1 pre-split)
        h = (jnp.dot(img_mean, w1a_ref[...], preferred_element_type=jnp.float32)
             + jnp.dot(txt_mean, w1b_ref[...], preferred_element_type=jnp.float32)
             + b1_ref[...])
        h = jnp.maximum(h, 0.0)                               # ReLU
        # TODO(synk): dropout (mlp_dropout_prob) treated as identity (inference).

        h = jnp.dot(h, w2_ref[...], preferred_element_type=jnp.float32) + b2_ref[...]
        h = jnp.maximum(h, 0.0)

        out = jnp.dot(h, w3_ref[...], preferred_element_type=jnp.float32) + b3_ref[...]
        out_ref[...] = out.astype(out_ref.dtype)


# --------------------------------------------------------------------------
# Sizing helpers
# --------------------------------------------------------------------------
def _round_up(x, m):
    return ((x + m - 1) // m) * m


def _cdiv(a, b):
    return -(-a // b)


def _vmem_capacity_bytes():
    """Generation-aware VMEM capacity (falls back to v7x-safe 64 MiB)."""
    try:
        info = pltpu.get_tpu_info()
        cap = getattr(info, "vmem_capacity_bytes", None)
        if cap:
            return int(cap)
    except Exception:
        pass
    return 64 << 20


def _pick_batch_tile(B):
    """Multiple-of-8 batch tile, <=512, with >=2 grid steps whenever B > 8
    (so dimension_semantics=('parallel',...) actually splits across v7x TCs)."""
    tb = _round_up(max(1, _cdiv(B, 2)), 8)
    return int(max(8, min(512, tb)))


def _pick_seq_chunk(S, nk):
    """Chunk length: multiple of 8 (layout rule) or the full sequence."""
    if nk <= 1:
        return S
    ck = _round_up(_cdiv(S, nk), 8)
    return int(min(S, max(8, ck)))


# --------------------------------------------------------------------------
# Wrapper
# --------------------------------------------------------------------------
def combined_model(img_hidden, txt_hidden, params, *, tb=None):
    """img_hidden: [B, S_img, H_img], txt_hidden: [B, S_txt, H_txt].

    Inputs may be bf16 (recommended: halves HBM traffic); accumulation is f32.
    """
    (w1a, w1b, b1, w2, b2, w3, b3) = params
    B, s_img, h_img = img_hidden.shape
    _, s_txt, h_txt = txt_hidden.shape
    num_classes = w3.shape[1]
    it_img = img_hidden.dtype.itemsize
    it_txt = txt_hidden.dtype.itemsize

    # ---- generation-aware VMEM clamp ---------------------------------------
    cap = _vmem_capacity_bytes()
    if cap >= (128 << 20):            # v5e / v6e: 128 MiB physical
        vmem_clamp = 100 << 20
    else:                             # v7x: 64 MiB per TC -> keep ~20% headroom
        vmem_clamp = max(16 << 20, int(cap * 0.8))

    weight_bytes = sum(int(p.size) * p.dtype.itemsize for p in params)

    # ---- batch tile ---------------------------------------------------------
    if tb is None:
        tb = _pick_batch_tile(B)
    tb = int(max(8, (tb // 8) * 8))

    # input double-buffer budget = clamp minus weights/scratch/headroom
    scratch_bytes = tb * (h_img + h_txt) * 4
    input_budget = vmem_clamp - 2 * weight_bytes - scratch_bytes - (6 << 20)
    input_budget = max(4 << 20, input_budget)

    # feasibility: even at the minimum seq chunk, the double-buffered inputs
    # (+1 tile headroom for in-kernel temporaries) must fit the budget.
    min_row = (min(s_img, 8) * h_img * it_img + min(s_txt, 8) * h_txt * it_txt)
    tb_max = max(8, (input_budget // max(1, 3 * min_row)) // 8 * 8)
    tb = int(min(tb, tb_max))

    # ---- seq chunking (decouples TB from S*H at realistic encoder shapes) ---
    full_step = tb * (s_img * h_img * it_img + s_txt * h_txt * it_txt)
    nk = max(1, _cdiv(3 * full_step, input_budget))   # x2 buffers + temps
    ck_img = _pick_seq_chunk(s_img, nk)
    ck_txt = _pick_seq_chunk(s_txt, nk)
    n_img = _cdiv(s_img, ck_img)
    n_txt = _cdiv(s_txt, ck_txt)
    nk = max(n_img, n_txt, 1)

    mask_img = (s_img % ck_img != 0) or (n_img < nk)
    mask_txt = (s_txt % ck_txt != 0) or (n_txt < nk)

    grid = (pl.cdiv(B, tb), nk)       # NO host-side batch pad (pure streaming)

    # ---- explicit VMEM limit -------------------------------------------------
    in_tile_bytes = tb * (ck_img * h_img * it_img + ck_txt * h_txt * it_txt)
    out_bytes = tb * num_classes * 4
    vmem_limit = (3 * in_tile_bytes + 2 * weight_bytes + scratch_bytes
                  + 2 * out_bytes + (2 << 20))
    vmem_limit = int(min(max(vmem_limit, 16 << 20), vmem_clamp))

    # ---- BlockSpecs ----------------------------------------------------------
    def seq_spec(ck, h, n_blocks):
        if n_blocks == nk:
            imap = lambda i, k: (i, k, 0)
        else:
            last = n_blocks - 1   # clamp; beyond-last chunks are masked to zero
            imap = lambda i, k: (i, jnp.minimum(k, last), 0)
        return pl.BlockSpec((tb, ck, h), imap)

    img_spec = seq_spec(ck_img, h_img, n_img)
    txt_spec = seq_spec(ck_txt, h_txt, n_txt)
    const2d = lambda shape: pl.BlockSpec(shape, lambda i, k: (0, 0))

    kernel = functools.partial(
        combined_kernel,
        inv_s_img=1.0 / float(s_img), inv_s_txt=1.0 / float(s_txt),
        s_img=s_img, s_txt=s_txt, ck_img=ck_img, ck_txt=ck_txt,
        mask_img=mask_img, mask_txt=mask_txt)

    out = pl.pallas_call(
        kernel,
        out_shape=jax.ShapeDtypeStruct((B, num_classes), jnp.float32),
        grid=grid,
        in_specs=[
            img_spec, txt_spec,
            const2d(w1a.shape), const2d(w1b.shape), const2d(b1.shape),
            const2d(w2.shape), const2d(b2.shape),
            const2d(w3.shape), const2d(b3.shape),
        ],
        # num_classes is tiny -> masked vst is fine (negligible output bytes).
        out_specs=pl.BlockSpec((tb, num_classes), lambda i, k: (i, 0)),
        scratch_shapes=[pltpu.VMEM((tb, h_img), jnp.float32),
                        pltpu.VMEM((tb, h_txt), jnp.float32)],
        compiler_params=pltpu.CompilerParams(
            dimension_semantics=("parallel", "arbitrary"),
            vmem_limit_bytes=vmem_limit),
    )(img_hidden, txt_hidden, w1a, w1b, b1, w2, b2, w3, b3)

    return out


# --------------------------------------------------------------------------
# Params / reference
# --------------------------------------------------------------------------
def init_mlp_params(key, in_dim, hidden_sizes, num_classes, h_img):
    """Deterministic MLP-head params. Weights are [in, out]; biases [1, out]."""
    dims = [in_dim] + list(hidden_sizes) + [num_classes]
    ws, bs = [], []
    for i in range(len(dims) - 1):
        key, kw = jax.random.split(key)
        scale = 1.0 / jnp.sqrt(jnp.float32(dims[i]))
        ws.append(jax.random.uniform(kw, (dims[i], dims[i + 1]),
                                     jnp.float32, -scale, scale))
        bs.append(jnp.zeros((1, dims[i + 1]), jnp.float32))
    w1, w2, w3 = ws
    b1, b2, b3 = bs
    # split first layer's weight at the concat boundary (image part / text part)
    w1a, w1b = w1[:h_img, :], w1[h_img:, :]
    return (w1a, w1b, b1, w2, b2, w3, b3)


def reference(img_hidden, txt_hidden, params):
    """Plain-JAX reference (f32 accumulation, same as kernel)."""
    (w1a, w1b, b1, w2, b2, w3, b3) = params
    fused = jnp.concatenate(
        [img_hidden.astype(jnp.float32).mean(axis=1),
         txt_hidden.astype(jnp.float32).mean(axis=1)], axis=-1)
    w1 = jnp.concatenate([w1a, w1b], axis=0)
    h = jnp.maximum(fused @ w1 + b1, 0.0)
    h = jnp.maximum(h @ w2 + b2, 0.0)
    return h @ w3 + b3


# --------------------------------------------------------------------------
# Demo / correctness check
# --------------------------------------------------------------------------
if __name__ == "__main__":
    # Small, module-consistent shapes (batch sized so the batch grid has 2
    # steps and the batch tile stays a multiple of 8 sublanes).
    B, S_IMG, H_IMG = 16, 8, 32    # image encoder last_hidden_state
    S_TXT, H_TXT = 8, 32           # text encoder last_hidden_state
    config = {"Models": {"mlp_num_classes": 2,
                         "mlp_hidden_sizes": [64, 32],
                         "mlp_dropout_prob": 0.1}}

    key = jax.random.PRNGKey(0)
    k_img, k_txt, k_mlp = jax.random.split(key, 3)
    # Encoder outputs fed in bf16 (half the HBM traffic); kernel accumulates f32.
    img_hidden = jax.random.normal(k_img, (B, S_IMG, H_IMG), jnp.float32
                                   ).astype(jnp.bfloat16)
    txt_hidden = jax.random.normal(k_txt, (B, S_TXT, H_TXT), jnp.float32
                                   ).astype(jnp.bfloat16)

    params = init_mlp_params(
        k_mlp,
        in_dim=H_IMG + H_TXT,
        hidden_sizes=config["Models"]["mlp_hidden_sizes"],
        num_classes=config["Models"]["mlp_num_classes"],
        h_img=H_IMG,
    )

    out = combined_model(img_hidden, txt_hidden, params, tb=8)  # grid=(2, 1)
    out = jax.block_until_ready(out)

    ref = reference(img_hidden, txt_hidden, params)
    assert out.shape == (B, config["Models"]["mlp_num_classes"])
    assert jnp.allclose(out, ref, atol=1e-3, rtol=1e-3), "mismatch vs reference"

    print("KERNEL_OK")
</pallas_src>

<mosaic_0001>
module attributes {stable_mosaic.version = 11 : i64} {
  func.func @combined_kernel(%arg0: i32, %arg1: i32, %arg2: memref<8x8x32xbf16, #tpu.memory_space<vmem>>, %arg3: memref<8x8x32xbf16, #tpu.memory_space<vmem>>, %arg4: memref<32x64xf32, #tpu.memory_space<vmem>>, %arg5: memref<32x64xf32, #tpu.memory_space<vmem>>, %arg6: memref<1x64xf32, #tpu.memory_space<vmem>>, %arg7: memref<64x32xf32, #tpu.memory_space<vmem>>, %arg8: memref<1x32xf32, #tpu.memory_space<vmem>>, %arg9: memref<32x2xf32, #tpu.memory_space<vmem>>, %arg10: memref<1x2xf32, #tpu.memory_space<vmem>>, %arg11: memref<8x2xf32, #tpu.memory_space<vmem>>, %arg12: memref<8x32xf32, #tpu.memory_space<vmem>>, %arg13: memref<8x32xf32, #tpu.memory_space<vmem>>) attributes {dimension_semantics = [#tpu.dimension_semantics<parallel>, #tpu.dimension_semantics<arbitrary>], iteration_bounds = array<i64: 2, 1>, scalar_prefetch = 0 : i64, scratch_operands = 2 : i64, tpu.core_type = #tpu.core_type<tc>, window_params = [{transform_indices = @transform_0, window_bounds = array<i64: 8, 8, 32>}, {transform_indices = @transform_1, window_bounds = array<i64: 8, 8, 32>}, {pipeline_mode = #tpu.pipeline_mode<synchronous>, transform_indices = @transform_2, window_bounds = array<i64: 32, 64>}, {pipeline_mode = #tpu.pipeline_mode<synchronous>, transform_indices = @transform_3, window_bounds = array<i64: 32, 64>}, {pipeline_mode = #tpu.pipeline_mode<synchronous>, transform_indices = @transform_4, window_bounds = array<i64: 1, 64>}, {pipeline_mode = #tpu.pipeline_mode<synchronous>, transform_indices = @transform_5, window_bounds = array<i64: 64, 32>}, {pipeline_mode = #tpu.pipeline_mode<synchronous>, transform_indices = @transform_6, window_bounds = array<i64: 1, 32>}, {pipeline_mode = #tpu.pipeline_mode<synchronous>, transform_indices = @transform_7, window_bounds = array<i64: 32, 2>}, {pipeline_mode = #tpu.pipeline_mode<synchronous>, transform_indices = @transform_8, window_bounds = array<i64: 1, 2>}, {transform_indices = @transform_9, window_bounds = array<i64: 8, 2>}]} {
    %c0_i32 = arith.constant 0 : i32
    %0 = arith.cmpi eq, %arg1, %c0_i32 : i32
    %1 = arith.extui %0 : i1 to i32
    %c0_i32_0 = arith.constant 0 : i32
    %2 = arith.cmpi ne, %1, %c0_i32_0 : i32
    scf.if %2 {
      %cst_17 = arith.constant 0.000000e+00 : f32
      %18 = vector.broadcast %cst_17 : f32 to vector<8x32xf32>
      %c0_18 = arith.constant 0 : index
      %c0_19 = arith.constant 0 : index
      %19 = vector.load %arg12[%c0_18, %c0_19] : memref<8x32xf32, #tpu.memory_space<vmem>>, vector<8x32xf32>
      tpu.vector_store %arg12[%c0_18, %c0_19], %18 {strides = array<i32>} : memref<8x32xf32, #tpu.memory_space<vmem>>, vector<8x32xf32>,
      %cst_20 = arith.constant 0.000000e+00 : f32
      %20 = vector.broadcast %cst_20 : f32 to vector<8x32xf32>
      %c0_21 = arith.constant 0 : index
      %c0_22 = arith.constant 0 : index
      %21 = vector.load %arg13[%c0_21, %c0_22] : memref<8x32xf32, #tpu.memory_space<vmem>>, vector<8x32xf32>
      tpu.vector_store %arg13[%c0_21, %c0_22], %20 {strides = array<i32>} : memref<8x32xf32, #tpu.memory_space<vmem>>, vector<8x32xf32>,
    } else {
    }
    %c0 = arith.constant 0 : index
    %c0_1 = arith.constant 0 : index
    %c0_2 = arith.constant 0 : index
    %3 = vector.load %arg2[%c0, %c0_1, %c0_2] : memref<8x8x32xbf16, #tpu.memory_space<vmem>>, vector<8x8x32xbf16>
    %c0_3 = arith.constant 0 : index
    %c0_4 = arith.constant 0 : index
    %4 = vector.load %arg12[%c0_3, %c0_4] : memref<8x32xf32, #tpu.memory_space<vmem>>, vector<8x32xf32>
    %5 = arith.extf %3 : vector<8x8x32xbf16> to vector<8x8x32xf32>
    %cst = arith.constant dense<0.000000e+00> : vector<8x32xf32>
    %6 = vector.multi_reduction <add>, %5, %cst [1] : vector<8x8x32xf32> to vector<8x32xf32>
    %7 = arith.addf %4, %6 : vector<8x32xf32>
    %c0_5 = arith.constant 0 : index
    %c0_6 = arith.constant 0 : index
    %8 = vector.load %arg12[%c0_5, %c0_6] : memref<8x32xf32, #tpu.memory_space<vmem>>, vector<8x32xf32>
    tpu.vector_store %arg12[%c0_5, %c0_6], %7 {strides = array<i32>} : memref<8x32xf32, #tpu.memory_space<vmem>>, vector<8x32xf32>,
    %c0_7 = arith.constant 0 : index
    %c0_8 = arith.constant 0 : index
    %c0_9 = arith.constant 0 : index
    %9 = vector.load %arg3[%c0_7, %c0_8, %c0_9] : memref<8x8x32xbf16, #tpu.memory_space<vmem>>, vector<8x8x32xbf16>
    %c0_10 = arith.constant 0 : index
    %c0_11 = arith.constant 0 : index
    %10 = vector.load %arg13[%c0_10, %c0_11] : memref<8x32xf32, #tpu.memory_space<vmem>>, vector<8x32xf32>
    %11 = arith.extf %9 : vector<8x8x32xbf16> to vector<8x8x32xf32>
    %cst_12 = arith.constant dense<0.000000e+00> : vector<8x32xf32>
    %12 = vector.multi_reduction <add>, %11, %cst_12 [1] : vector<8x8x32xf32> to vector<8x32xf32>
    %13 = arith.addf %10, %12 : vector<8x32xf32>
    %c0_13 = arith.constant 0 : index
    %c0_14 = arith.constant 0 : index
    %14 = vector.load %arg13[%c0_13, %c0_14] : memref<8x32xf32, #tpu.memory_space<vmem>>, vector<8x32xf32>
    tpu.vector_store %arg13[%c0_13, %c0_14], %13 {strides = array<i32>} : memref<8x32xf32, #tpu.memory_space<vmem>>, vector<8x32xf32>,
    %c0_i32_15 = arith.constant 0 : i32
    %15 = arith.cmpi eq, %arg1, %c0_i32_15 : i32
    %16 = arith.extui %15 : i1 to i32
    %c0_i32_16 = arith.constant 0 : i32
    %17 = arith.cmpi ne, %16, %c0_i32_16 : i32
    scf.if %17 {
      %c0_17 = arith.constant 0 : index
      %c0_18 = arith.constant 0 : index
      %18 = vector.load %arg12[%c0_17, %c0_18] : memref<8x32xf32, #tpu.memory_space<vmem>>, vector<8x32xf32>
      %cst_19 = arith.constant 1.250000e-01 : f32
      %19 = vector.broadcast %cst_19 : f32 to vector<8x32xf32>
      %20 = arith.mulf %18, %19 : vector<8x32xf32>
      %c0_20 = arith.constant 0 : index
      %c0_21 = arith.constant 0 : index
      %21 = vector.load %arg13[%c0_20, %c0_21] : memref<8x32xf32, #tpu.memory_space<vmem>>, vector<8x32xf32>
      %cst_22 = arith.constant 1.250000e-01 : f32
      %22 = vector.broadcast %cst_22 : f32 to vector<8x32xf32>
      %23 = arith.mulf %21, %22 : vector<8x32xf32>
      %c0_23 = arith.constant 0 : index
      %c0_24 = arith.constant 0 : index
      %24 = vector.load %arg4[%c0_23, %c0_24] : memref<32x64xf32, #tpu.memory_space<vmem>>, vector<32x64xf32>
      %cst_25 = arith.constant dense<0.000000e+00> : vector<8x64xf32>
      %25 = tpu.matmul %20, %24, %cst_25 {dimension_numbers = #tpu.dot_dimension_numbers<[1], [0], [0], [1], [0, 0, 1, 1], [], []>} : vector<8x32xf32>, vector<32x64xf32>, vector<8x64xf32> -> vector<8x64xf32>
      %c0_26 = arith.constant 0 : index
      %c0_27 = arith.constant 0 : index
      %26 = vector.load %arg5[%c0_26, %c0_27] : memref<32x64xf32, #tpu.memory_space<vmem>>, vector<32x64xf32>
      %cst_28 = arith.constant dense<0.000000e+00> : vector<8x64xf32>
      %27 = tpu.matmul %23, %26, %cst_28 {dimension_numbers = #tpu.dot_dimension_numbers<[1], [0], [0], [1], [0, 0, 1, 1], [], []>} : vector<8x32xf32>, vector<32x64xf32>, vector<8x64xf32> -> vector<8x64xf32>
      %28 = arith.addf %25, %27 : vector<8x64xf32>
      %c0_29 = arith.constant 0 : index
      %c0_30 = arith.constant 0 : index
      %29 = vector.load %arg6[%c0_29, %c0_30] : memref<1x64xf32, #tpu.memory_space<vmem>>, vector<1x64xf32>
      %30 = vector.broadcast %29 : vector<1x64xf32> to vector<8x64xf32>
      %31 = arith.addf %28, %30 : vector<8x64xf32>
      %cst_31 = arith.constant 0.000000e+00 : f32
      %32 = vector.broadcast %cst_31 : f32 to vector<8x64xf32>
      %33 = arith.maximumf %31, %32 : vector<8x64xf32>
      %c0_32 = arith.constant 0 : index
      %c0_33 = arith.constant 0 : index
      %34 = vector.load %arg7[%c0_32, %c0_33] : memref<64x32xf32, #tpu.memory_space<vmem>>, vector<64x32xf32>
      %cst_34 = arith.constant dense<0.000000e+00> : vector<8x32xf32>
      %35 = tpu.matmul %33, %34, %cst_34 {dimension_numbers = #tpu.dot_dimension_numbers<[1], [0], [0], [1], [0, 0, 1, 1], [], []>} : vector<8x64xf32>, vector<64x32xf32>, vector<8x32xf32> -> vector<8x32xf32>
      %c0_35 = arith.constant 0 : index
      %c0_36 = arith.constant 0 : index
      %36 = vector.load %arg8[%c0_35, %c0_36] : memref<1x32xf32, #tpu.memory_space<vmem>>, vector<1x32xf32>
      %37 = vector.broadcast %36 : vector<1x32xf32> to vector<8x32xf32>
      %38 = arith.addf %35, %37 : vector<8x32xf32>
      %cst_37 = arith.constant 0.000000e+00 : f32
      %39 = vector.broadcast %cst_37 : f32 to vector<8x32xf32>
      %40 = arith.maximumf %38, %39 : vector<8x32xf32>
      %c0_38 = arith.constant 0 : index
      %c0_39 = arith.constant 0 : index
      %41 = vector.load %arg9[%c0_38, %c0_39] : memref<32x2xf32, #tpu.memory_space<vmem>>, vector<32x2xf32>
      %cst_40 = arith.constant dense<0.000000e+00> : vector<8x2xf32>
      %42 = tpu.matmul %40, %41, %cst_40 {dimension_numbers = #tpu.dot_dimension_numbers<[1], [0], [0], [1], [0, 0, 1, 1], [], []>} : vector<8x32xf32>, vector<32x2xf32>, vector<8x2xf32> -> vector<8x2xf32>
      %c0_41 = arith.constant 0 : index
      %c0_42 = arith.constant 0 : index
      %43 = vector.load %arg10[%c0_41, %c0_42] : memref<1x2xf32, #tpu.memory_space<vmem>>, vector<1x2xf32>
      %44 = vector.broadcast %43 : vector<1x2xf32> to vector<8x2xf32>
      %45 = arith.addf %42, %44 : vector<8x2xf32>
      %c0_43 = arith.constant 0 : index
      %c0_44 = arith.constant 0 : index
      %46 = vector.load %arg11[%c0_43, %c0_44] : memref<8x2xf32, #tpu.memory_space<vmem>>, vector<8x2xf32>
      tpu.vector_store %arg11[%c0_43, %c0_44], %45 {strides = array<i32>} : memref<8x2xf32, #tpu.memory_space<vmem>>, vector<8x2xf32>,
    } else {
    }
    return
  }
  func.func @transform_0(%arg0: i32, %arg1: i32) -> (i32, i32, i32) {
    %c0_i32 = arith.constant 0 : i32
    %c0_i32_0 = arith.constant 0 : i32
    return %arg0, %arg1, %c0_i32 : i32, i32, i32
  }
  func.func @transform_1(%arg0: i32, %arg1: i32) -> (i32, i32, i32) {
    %c0_i32 = arith.constant 0 : i32
    %c0_i32_0 = arith.constant 0 : i32
    return %arg0, %arg1, %c0_i32 : i32, i32, i32
  }
  func.func @transform_2(%arg0: i32, %arg1: i32) -> (i32, i32) {
    %c0_i32 = arith.constant 0 : i32
    %c0_i32_0 = arith.constant 0 : i32
    %c0_i32_1 = arith.constant 0 : i32
    return %c0_i32, %c0_i32_0 : i32, i32
  }
  func.func @transform_3(%arg0: i32, %arg1: i32) -> (i32, i32) {
    %c0_i32 = arith.constant 0 : i32
    %c0_i32_0 = arith.constant 0 : i32
    %c0_i32_1 = arith.constant 0 : i32
    return %c0_i32, %c0_i32_0 : i32, i32
  }
  func.func @transform_4(%arg0: i32, %arg1: i32) -> (i32, i32) {
    %c0_i32 = arith.constant 0 : i32
    %c0_i32_0 = arith.constant 0 : i32
    %c0_i32_1 = arith.constant 0 : i32
    return %c0_i32, %c0_i32_0 : i32, i32
  }
  func.func @transform_5(%arg0: i32, %arg1: i32) -> (i32, i32) {
    %c0_i32 = arith.constant 0 : i32
    %c0_i32_0 = arith.constant 0 : i32
    %c0_i32_1 = arith.constant 0 : i32
    return %c0_i32, %c0_i32_0 : i32, i32
  }
  func.func @transform_6(%arg0: i32, %arg1: i32) -> (i32, i32) {
    %c0_i32 = arith.constant 0 : i32
    %c0_i32_0 = arith.constant 0 : i32
    %c0_i32_1 = arith.constant 0 : i32
    return %c0_i32, %c0_i32_0 : i32, i32
  }
  func.func @transform_7(%arg0: i32, %arg1: i32) -> (i32, i32) {
    %c0_i32 = arith.constant 0 : i32
    %c0_i32_0 = arith.constant 0 : i32
    %c0_i32_1 = arith.constant 0 : i32
    return %c0_i32, %c0_i32_0 : i32, i32
  }
  func.func @transform_8(%arg0: i32, %arg1: i32) -> (i32, i32) {
    %c0_i32 = arith.constant 0 : i32
    %c0_i32_0 = arith.constant 0 : i32
    %c0_i32_1 = arith.constant 0 : i32
    return %c0_i32, %c0_i32_0 : i32, i32
  }
  func.func @transform_9(%arg0: i32, %arg1: i32) -> (i32, i32) {
    %c0_i32 = arith.constant 0 : i32
    %c0_i32_0 = arith.constant 0 : i32
    return %arg0, %c0_i32 : i32, i32
  }
}

</mosaic_0001>

<bundles_post_ra>
// kernel: tpu_custom_call.1
= control target key start
LH: loop header
LB: loop body
LE: loop exit
PB: predicated region body
PF: predicated region fallthrough
CT: control target
= control target key end

     0   :  { %14 = vsyncpa [#allocation5], 0  ;;  %s1601_s0 = inlined_call_operand.vmem [shape: bf16[16,8,32], index: 0, kind: input, shape index: {}]   ;;  %s1602_s1 = inlined_call_operand.vmem [shape: bf16[16,8,32], index: 1, kind: input, shape index: {}]   ;;  %s1603_s2 = inlined_call_operand.hbm [shape: f32[32,64], index: 2, kind: input, shape index: {}]   ;;  %s1604_s3 = inlined_call_operand.hbm [shape: f32[32,64], index: 3, kind: input, shape index: {}]   ;;  %s1605_s4 = inlined_call_operand.vmem [shape: f32[1,64], index: 4, kind: input, shape index: {}]   ;;  %s1606_s5 = inlined_call_operand.vmem [shape: f32[64,32], index: 5, kind: input, shape index: {}]   ;;  %s1607_s6 = inlined_call_operand.vmem [shape: f32[1,32], index: 6, kind: input, shape index: {}]   ;;  %s1608_s7 = inlined_call_operand.vmem [shape: f32[32,2], index: 7, kind: input, shape index: {}]   ;;  %s1609_s8 = inlined_call_operand.vmem [shape: f32[1,2], index: 8, kind: input, shape index: {}]   ;;  %s1610_s9 = inlined_call_operand.vmem [shape: f32[16,2], index: 9, kind: output, shape index: {}]  }
   0x1   :  { %15 = vsyncpa [#allocation7], 0  ;;  %s1390_s30 = smov 0   ;;  %s1392_s10 = smov 0  }
   0x2   :  { %s1394_s11 = smov 0  }
   0x3 LB: > { %s1064_s12 = sadd.s32 4294967295, %s1332_s11   ;;  %s33_s13 = sadd.s32 1, %s1328_s10  ;;  %s1332_s11 = sphi %s1394_s11, %s21_s11   ;;  %s1328_s10 = sphi %s1392_s10, %s1615_s10   ;;  %s1324_s30 = sphi %s1390_s30, %s1614_s30  }
   0x4   : > { %p35_p0 = scmp.ge.s32.totalorder %s33_s13, 2  ;;  %p1066_p1 = scmp.ge.s32.totalorder %s1332_s11, 1 }
   0x5   : > { %p267_p2 = scmp.lt.s32.totalorder %s1332_s11, 3  ;;  %p1415_p4 = scmp.eq.s32.totalorder %s1064_s12, 0 }
   0x6   : > { %s1617_s13 = smov (%p35_p0, %s33_s13), 0  ;;  %s1334_s16 = smov [#allocation4]  }
   0x7   : > { %p1411_p3 = pnand %p1066_p1, %p267_p2  ;;  %s279_s17 = sshll.u32 %s1334_s16, 4  ;;  %s280_s17 = int_to_ptr.vmem [resolvable:$true] %s279_s17 }
   0x8   : > { %s1335_s19 = smov [#allocation6]   ;;  %s1261_s21 = scalar_lea.vmem %s280_s17, 512 }
   0x9   : > { %p1209_p5 = pneg %p1411_p3  ;;  %s292_s20 = sshll.u32 %s1335_s19, 4  ;;  %s293_s20 = int_to_ptr.vmem [resolvable:$true] %s292_s20 }
   0xa   : > { %p1262_p8 = scmp.ne.s32.totalorder %s280_s17, %s1261_s21  ;;  %p1269_p11 = scmp.lt.s32.totalorder %s280_s17, %s280_s17 }
   0xb   : > { %p1423_p6 = pnand %p1415_p4, %p1209_p5  ;;  %p1270_p12 = scmp.lt.s32.totalorder %s1261_s21, %s1261_s21 }
   0xd   : > { %p1252_p7 = pneg %p1423_p6  ;;  %p1271_p13 = por %p1270_p12, %p1269_p11 }
   0xf   : > { %p1264_p9 = pnand %p1262_p8, %p1252_p7 }
  0x11   : > { %p1265_p10 = pneg %p1264_p9 }
  0x13   : > { %p1272_p0 = pnand %p1271_p13, %p1265_p10 }
  0x15   : > { %1275 = shalt.err (!%p1272_p0)
}
  0x16   : > { %s1336_s22 = smov 128   ;;  %s1337_s23 = smov 8  }
  0x17   : > { %1212 = dma.hbm_to_vmem [thread:$0]  (!%p1423_p6), %s1603_s2, 512, %s280_s17, [#allocation5], %s1336_s22, %s1336_s22, %s1337_s23  }
  0x18   : > { %s1287_s26 = scalar_lea.vmem %s293_s20, 512  ;;  %p1295_p8 = scmp.lt.s32.totalorder %s293_s20, %s293_s20 }
  0x19   : > { %p1288_p1 = scmp.ne.s32.totalorder %s293_s20, %s1287_s26  ;;  %p1296_p9 = scmp.lt.s32.totalorder %s1287_s26, %s1287_s26 }
  0x1b   : > { %p1290_p2 = pnand %p1288_p1, %p1252_p7  ;;  %p1297_p11 = por %p1296_p9, %p1295_p8 }
  0x1d   : > { %p1291_p5 = pneg %p1290_p2 }
  0x1f   : > { %p1298_p10 = pnand %p1297_p11, %p1291_p5 }
  0x21   : > { %1301 = shalt.err (!%p1298_p10)
}
  0x22   : > { %1215 = dma.hbm_to_vmem [thread:$0]  (!%p1423_p6), %s1604_s3, 512, %s293_s20, [#allocation7], %s1336_s22, %s1336_s22, %s1337_s23  }
  0x23   : > { %347 = sbr.rel (%p1411_p3) target bundleno = 694 (0x2b6), region = 56 }
  0x28   : > { %1315 = dma.done.wait (%p1415_p4), [#allocation5], 512  }
  0x29   : > { %1317 = vsyncadd (%p1415_p4), [#allocation5], 4294966784 }
  0x2a   : > { %1319 = dma.done.wait (%p1415_p4), [#allocation7], 512  }
  0x2b   : > { %1321 = vsyncadd (%p1415_p4), [#allocation7], 4294966784  ;;  %s1073_s29 = sshll.u32 %s1324_s30, 3  ;;  %vm423_vm0 = vcmask 261120   ;;  %v1338_v0 = vmov 0.0   ;;  %vm1339_vm1 = vmmov 0  }
  0x2c   : > { %1149 = vmatprep.subr.mxu0 %v1338_v0  ;;  %1160 = vmatprep.subr.mxu1 %v1338_v0  ;;  %p398_p3 = scmp.lt.s32.totalorder %s1073_s29, 15  ;;  %425 = vst.msk [vmem:[#allocation3] sm:$0xff] %vm423_vm0, %v1338_v0  ;;  %424 = vst.msk [vmem:[#allocation2] sm:$0xff] %vm423_vm0, %v1338_v0  ;;  %v630_v1 = vld [vmem:[#allocation6 + $0x18] sm:$0xff]  ;;  %v629_v3 = vld [vmem:[#allocation6 + $0x10] sm:$0xff]  ;;  %vm508_vm2 = vcmask 1041409  }
  0x2d   : > { %1157 = vmatprep.mubr.msk.f32.mxu0 %vm1339_vm1, %v1338_v0  ;;  %1168 = vmatprep.mubr.msk.f32.mxu1 %vm1339_vm1, %v1338_v0  ;;  %v626_v2 = vld [vmem:[#allocation4 + $0x18] sm:$0xff]  ;;  %v625_v4 = vld [vmem:[#allocation4 + $0x10] sm:$0xff]  ;;  %v628_v5 = vld [vmem:[#allocation6 + $0x8] sm:$0xff]  ;;  %vm510_vm3 = vcmask 1042434   ;;  %vm512_vm4 = vcmask 1043459   ;;  %vm514_vm5 = vcmask 1044484  }
  0x2e   : > { %s1619_s29 = smov (!%p398_p3, %s1073_s29), 15  ;;  %1150 = vmatpush3.msra.mxu0 %v630_v1  ;;  %1161 = vmatpush3.msra.mxu1 %v626_v2  ;;  %v624_v6 = vld [vmem:[#allocation4 + $0x8] sm:$0xff]  ;;  %v627_v13 = vld [vmem:[#allocation6] sm:$0xff]  ;;  %vm516_vm6 = vcmask 1045509   ;;  %vm518_vm7 = vcmask 1046534   ;;  %vm520_vm8 = vcmask 1047559  }
  0x2f   : > { %s1074_s12 = sshll.u32 %s1619_s29, 2  ;;  %1151 = vmatprep.subr.mxu0 %v1338_v0  ;;  %1162 = vmatprep.subr.mxu1 %v1338_v0  ;;  %v623_v14 = vld [vmem:[#allocation4] sm:$0xff]  ;;  %vm801_vm9 = vcmask 523264   ;;  %p415_p4 = scmp.lt.s32.totalorder %s1324_s30, 1  ;;  %vm960_vm10 = vcmask 15360  }
  0x30   : > { %s413_s16 = scalar_lea.vmem %s1602_s1, %s1074_s12  ;;  %1152 = vmatpush3.msra.mxu0 %v629_v3  ;;  %1163 = vmatpush3.msra.mxu1 %v625_v4  ;;  %s1495_s19 = scalar_lea.vmem %s1601_s0, %s1074_s12 }
  0x31   : > { %v1104_v7 = vld [vmem:[%s413_s16] sm:$0xff]   ;;  %v1122_v10 = vld [vmem:[%s413_s16 + $0x8] sm:$0xff]   ;;  %v1123_v11 = vld [vmem:[%s413_s16 + $0x10] sm:$0xff]   ;;  %1153 = vmatprep.subr.mxu0 %v1338_v0  ;;  %1164 = vmatprep.subr.mxu1 %v1338_v0  ;;  %s1621_s30 = smov (!%p415_p4, %s1324_s30), 1 }
  0x32   : > { %v1105_v8 = vunpack.c.l.bf16 %v1104_v7  ;;  %v1106_v9 = vunpack.c.h.bf16 %v1104_v7  ;;  %v1124_v12 = vld [vmem:[%s413_s16 + $0x18] sm:$0xff]   ;;  %v1109_v15 = vunpack.c.l.bf16 %v1122_v10  ;;  %v1110_v16 = vunpack.c.h.bf16 %v1122_v10  ;;  %1154 = vmatpush3.msra.mxu0 %v628_v5  ;;  %1165 = vmatpush3.msra.mxu1 %v624_v6  ;;  %v1088_v63 = vld [vmem:[%s1495_s19] sm:$0xff]   ;;  %v1120_v10 = vld [vmem:[%s1495_s19 + $0x10] sm:$0xff]   ;;  %s1077_s14 = sshll.u32 %s1621_s30, 3 }
  0x33   : > { %v1113_v17 = vunpack.c.l.bf16 %v1123_v11  ;;  %v1114_v18 = vunpack.c.h.bf16 %v1123_v11  ;;  %v1117_v19 = vunpack.c.l.bf16 %v1124_v12  ;;  %v1118_v20 = vunpack.c.h.bf16 %v1124_v12  ;;  %1155 = vmatprep.subr.mxu0 %v1338_v0  ;;  %1166 = vmatprep.subr.mxu1 %v1338_v0 }
  0x34   : > { %v542_v21 = vsel %vm423_vm0, %v1105_v8, 0.0  ;;  %v549_v22 = vsel %vm423_vm0, %v1106_v9, 0.0  ;;  %v556_v25 = vsel %vm423_vm0, %v1109_v15, 0.0  ;;  %v563_v26 = vsel %vm423_vm0, %v1110_v16, 0.0  ;;  %1156 = vmatpush3.msra.mxu0 %v627_v13  ;;  %1167 = vmatpush3.msra.mxu1 %v623_v14  ;;  %v1119_v9 = vld [vmem:[%s1495_s19 + $0x8] sm:$0xff]  }
  0x35   : > { %v543_v23 = vrot.slane %v542_v21, 4  ;;  %v550_v24 = vrot.slane %v549_v22, 4  ;;  %v557_v27 = vrot.slane %v556_v25, 4  ;;  %v564_v28 = vrot.slane %v563_v26, 4  ;;  %1171 = vmatprep.subr.mxu0 %v1338_v0  ;;  %1190 = vmatprep.subr.mxu1 %v1338_v0 }
  0x36   : > { %v570_v29 = vsel %vm423_vm0, %v1113_v17, 0.0  ;;  %v577_v30 = vsel %vm423_vm0, %v1114_v18, 0.0  ;;  %v584_v37 = vsel %vm423_vm0, %v1117_v19, 0.0  ;;  %v591_v38 = vsel %vm423_vm0, %v1118_v20, 0.0  ;;  %v1121_v19 = vld [vmem:[%s1495_s19 + $0x18] sm:$0xff]   ;;  %s418_s19 = scalar_lea.vmem %s1610_s9, %s1077_s14 }
  0x37   : > { %v544_v31 = vadd.f32 %v543_v23, %v542_v21  ;;  %v551_v32 = vadd.f32 %v550_v24, %v549_v22  ;;  %v571_v33 = vrot.slane %v570_v29, 4  ;;  %v578_v34 = vrot.slane %v577_v30, 4 }
  0x38   : > { %v558_v35 = vadd.f32 %v557_v27, %v556_v25  ;;  %v565_v36 = vadd.f32 %v564_v28, %v563_v26  ;;  %v585_v45 = vrot.slane %v584_v37, 4  ;;  %v592_v46 = vrot.slane %v591_v38, 4  ;;  %v533_v28 = vld [vmem:[#allocation3] sm:$0xff] }
  0x39   : > { %v545_v39 = vrot.slane %v544_v31, 2  ;;  %v552_v40 = vrot.slane %v551_v32, 2  ;;  %v572_v41 = vadd.f32 %v571_v33, %v570_v29  ;;  %v579_v42 = vadd.f32 %v578_v34, %v577_v30 }
  0x3a   : > { %v559_v43 = vrot.slane %v558_v35, 2  ;;  %v566_v44 = vrot.slane %v565_v36, 2  ;;  %v586_v53 = vadd.f32 %v585_v45, %v584_v37  ;;  %v593_v54 = vadd.f32 %v592_v46, %v591_v38 }
  0x3b   : > { %v546_v47 = vadd.f32 %v545_v39, %v544_v31  ;;  %v553_v48 = vadd.f32 %v552_v40, %v551_v32  ;;  %v573_v49 = vrot.slane %v572_v41, 2  ;;  %v580_v50 = vrot.slane %v579_v42, 2 }
  0x3c   : > { %v560_v51 = vadd.f32 %v559_v43, %v558_v35  ;;  %v567_v52 = vadd.f32 %v566_v44, %v565_v36  ;;  %v587_v61 = vrot.slane %v586_v53, 2  ;;  %v594_v62 = vrot.slane %v593_v54, 2 }
  0x3d   : > { %v547_v55 = vrot.slane %v546_v47, 1  ;;  %v554_v56 = vrot.slane %v553_v48, 1  ;;  %v574_v57 = vadd.f32 %v573_v49, %v572_v41  ;;  %v581_v58 = vadd.f32 %v580_v50, %v579_v42 }
  0x3e   : > { %v561_v59 = vrot.slane %v560_v51, 1  ;;  %v568_v60 = vrot.slane %v567_v52, 1  ;;  %v588_v7 = vadd.f32 %v587_v61, %v586_v53  ;;  %v595_v8 = vadd.f32 %v594_v62, %v593_v54 }
  0x3f   : > { %v548_v1 = vadd.f32 %v547_v55, %v546_v47  ;;  %v555_v2 = vadd.f32 %v554_v56, %v553_v48  ;;  %v575_v3 = vrot.slane %v574_v57, 1  ;;  %v582_v4 = vrot.slane %v581_v58, 1 }
  0x40   : > { %v562_v5 = vadd.f32 %v561_v59, %v560_v51  ;;  %v569_v6 = vadd.f32 %v568_v60, %v567_v52  ;;  %v1089_v14 = vunpack.c.l.bf16 %v1088_v63  ;;  %v589_v15 = vrot.slane %v588_v7, 1 }
  0x41   : > { %v576_v11 = vadd.f32 %v575_v3, %v574_v57  ;;  %v583_v12 = vadd.f32 %v582_v4, %v581_v58  ;;  %v606_v13 = vsel %vm508_vm2, %v555_v2, %v548_v1  ;;  %v596_v16 = vrot.slane %v595_v8, 1 }
  0x42   : > { %v607_v17 = vsel %vm510_vm3, %v562_v5, %v606_v13  ;;  %v1090_v18 = vunpack.c.h.bf16 %v1088_v63  ;;  %v1093_v21 = vunpack.c.l.bf16 %v1119_v9  ;;  %v1094_v22 = vunpack.c.h.bf16 %v1119_v9 }
  0x43   : > { %v608_v20 = vsel %vm512_vm4, %v569_v6, %v607_v17  ;;  %v1097_v23 = vunpack.c.l.bf16 %v1120_v10  ;;  %v590_v24 = vadd.f32 %v589_v15, %v588_v7  ;;  %v597_v25 = vadd.f32 %v596_v16, %v595_v8 }
  0x44   : > { %v609_v26 = vsel %vm514_vm5, %v576_v11, %v608_v20  ;;  %v1098_v27 = vunpack.c.h.bf16 %v1120_v10  ;;  %v1101_v30 = vunpack.c.l.bf16 %v1121_v19  ;;  %v1102_v31 = vunpack.c.h.bf16 %v1121_v19 }
  0x45   : > { %v610_v29 = vsel %vm516_vm6, %v583_v12, %v609_v26  ;;  %v444_v32 = vsel %vm423_vm0, %v1089_v14, 0.0  ;;  %v451_v35 = vsel %vm423_vm0, %v1090_v18, 0.0  ;;  %v458_v36 = vsel %vm423_vm0, %v1093_v21, 0.0 }
  0x46   : > { %v611_v33 = vsel %vm518_vm7, %v590_v24, %v610_v29  ;;  %v445_v34 = vrot.slane %v444_v32, 4  ;;  %v452_v38 = vrot.slane %v451_v35, 4  ;;  %v459_v39 = vrot.slane %v458_v36, 4 }
  0x47   : > { %v612_v37 = vsel %vm520_vm8, %v597_v25, %v611_v33  ;;  %v465_v40 = vsel %vm423_vm0, %v1094_v22, 0.0  ;;  %v472_v44 = vsel %vm423_vm0, %v1097_v23, 0.0  ;;  %v479_v48 = vsel %vm423_vm0, %v1098_v27, 0.0  ;;  %v793_v23 = vld [vmem:[%s1606_s5 + $0x38] sm:$0xff] }
  0x48   : > { %v614_v41 = vadd.f32 %v612_v37, %v533_v28  ;;  %v446_v42 = vadd.f32 %v445_v34, %v444_v32  ;;  %v466_v43 = vrot.slane %v465_v40, 4  ;;  %v453_v45 = vadd.f32 %v452_v38, %v451_v35  ;;  %v791_v35 = vld [vmem:[%s1606_s5 + $0x28] sm:$0xff]  ;;  %v434_v37 = vld [vmem:[#allocation2] sm:$0xff] }
  0x49   : > { %v460_v46 = vadd.f32 %v459_v39, %v458_v36  ;;  %v473_v47 = vrot.slane %v472_v44, 4  ;;  %v480_v51 = vrot.slane %v479_v48, 4  ;;  %v486_v52 = vsel %vm423_vm0, %v1101_v30, 0.0  ;;  %v792_v30 = vld [vmem:[%s1606_s5 + $0x30] sm:$0xff] }
  0x4a   : > { %615 = vst.msk [vmem:[#allocation3] sm:$0xff] %vm423_vm0, %v614_v41  ;;  %v447_v49 = vrot.slane %v446_v42, 2  ;;  %v467_v50 = vadd.f32 %v466_v43, %v465_v40  ;;  %v454_v53 = vrot.slane %v453_v45, 2  ;;  %v487_v56 = vrot.slane %v486_v52, 4  ;;  %v790_v40 = vld [vmem:[%s1606_s5 + $0x20] sm:$0xff] }
  0x4b   : > { %v461_v54 = vrot.slane %v460_v46, 2  ;;  %v474_v55 = vadd.f32 %v473_v47, %v472_v44  ;;  %v481_v59 = vadd.f32 %v480_v51, %v479_v48  ;;  %v493_v60 = vsel %vm423_vm0, %v1102_v31, 0.0  ;;  %v787_v47 = vld [vmem:[%s1606_s5 + $0x8] sm:$0xff]  ;;  %v786_v48 = vld [vmem:[%s1606_s5] sm:$0xff] }
  0x4c   : > { %v448_v57 = vadd.f32 %v447_v49, %v446_v42  ;;  %v468_v58 = vrot.slane %v467_v50, 2  ;;  %v455_v61 = vadd.f32 %v454_v53, %v453_v45  ;;  %v488_v1 = vadd.f32 %v487_v56, %v486_v52  ;;  %v789_v45 = vld [vmem:[%s1606_s5 + $0x18] sm:$0xff]  ;;  %v1080_v53 = vld [vmem:[%s1605_s4] ss:$0 sm:$0xff] }
  0x4d   : > { %v462_v62 = vadd.f32 %v461_v54, %v460_v46  ;;  %v475_v63 = vrot.slane %v474_v55, 2  ;;  %v482_v4 = vrot.slane %v481_v59, 2  ;;  %v494_v5 = vrot.slane %v493_v60, 4  ;;  %v788_v46 = vld [vmem:[%s1606_s5 + $0x10] sm:$0xff]  ;;  %v879_v49 = vld [vmem:[%s1608_s7 + $0x18] sm:$0xff] }
  0x4e   : > { %v449_v2 = vrot.slane %v448_v57, 1  ;;  %v469_v3 = vadd.f32 %v468_v58, %v467_v50  ;;  %v456_v6 = vrot.slane %v455_v61, 1  ;;  %v489_v9 = vrot.slane %v488_v1, 2  ;;  %v878_v58 = vld [vmem:[%s1608_s7 + $0x10] sm:$0xff] }
  0x4f   : > { %v463_v7 = vrot.slane %v462_v62, 1  ;;  %v476_v8 = vadd.f32 %v475_v63, %v474_v55  ;;  %v483_v12 = vadd.f32 %v482_v4, %v481_v59  ;;  %v495_v13 = vadd.f32 %v494_v5, %v493_v60  ;;  %v877_v59 = vld [vmem:[%s1608_s7 + $0x8] sm:$0xff]  ;;  %v876_v60 = vld [vmem:[%s1608_s7] sm:$0xff] }
  0x50   : > { %v450_v10 = vadd.f32 %v449_v2, %v448_v57  ;;  %v470_v11 = vrot.slane %v469_v3, 1  ;;  %v457_v15 = vadd.f32 %v456_v6, %v455_v61  ;;  %v490_v18 = vadd.f32 %v489_v9, %v488_v1  ;;  %v1081_v61 = vld [vmem:[%s1607_s6] ss:$0 sm:$0xff] }
  0x51   : > { %v621_v14 = vld [vmem:[#allocation3] sm:$0xff]  ;;  %v464_v16 = vadd.f32 %v463_v7, %v462_v62  ;;  %v477_v17 = vrot.slane %v476_v8, 1  ;;  %v484_v21 = vrot.slane %v483_v12, 1  ;;  %v496_v22 = vrot.slane %v495_v13, 2 }
  0x52   : > { %v622_v19 = vmul.f32 0.125, %v621_v14  ;;  %v471_v20 = vadd.f32 %v470_v11, %v469_v3  ;;  %v491_v25 = vrot.slane %v490_v18, 1  ;;  %v509_v26 = vsel %vm508_vm2, %v457_v15, %v450_v10 }
  0x53   : > { %v478_v24 = vadd.f32 %v477_v17, %v476_v8  ;;  %v485_v27 = vadd.f32 %v484_v21, %v483_v12  ;;  %v497_v28 = vadd.f32 %v496_v22, %v495_v13  ;;  %v511_v29 = vsel %vm510_vm3, %v464_v16, %v509_v26 }
  0x54   : > { %1158 = vmatmul.mubr.msk.f32.vlgmr.msra.gmra.mxu0 %vm423_vm0, %v622_v19  ;;  %v492_v31 = vadd.f32 %v491_v25, %v490_v18  ;;  %v513_v32 = vsel %vm512_vm4, %v471_v20, %v511_v29 }
  0x55   : > { %1172 = vmatpush3.msra.mxu0 %v793_v23  ;;  %1187 = vmatprep.mubr.msk.f32.mxu0 %vm1339_vm1, %v1338_v0  ;;  %v498_v33 = vrot.slane %v497_v28, 1  ;;  %v515_v34 = vsel %vm514_vm5, %v478_v24, %v513_v32 }
  0x56   : > { %1173 = vmatprep.subr.mxu0 %v1338_v0  ;;  %v517_v36 = vsel %vm516_vm6, %v485_v27, %v515_v34 }
  0x57   : > { %1174 = vmatpush3.msra.mxu0 %v792_v30  ;;  %v499_v38 = vadd.f32 %v498_v33, %v497_v28  ;;  %v519_v39 = vsel %vm518_vm7, %v492_v31, %v517_v36 }
  0x58   : > { %1175 = vmatprep.subr.mxu0 %v1338_v0 }
  0x59   : > { %1176 = vmatpush3.msra.mxu0 %v791_v35  ;;  %v521_v41 = vsel %vm520_vm8, %v499_v38, %v519_v39 }
  0x5a   : > { %1177 = vmatprep.subr.mxu0 %v1338_v0  ;;  %v523_v42 = vadd.f32 %v521_v41, %v434_v37 }
  0x5b   : > { %1178 = vmatpush3.msra.mxu0 %v790_v40 }
  0x5c   : > { %1179 = vmatprep.subr.mxu0 %v1338_v0  ;;  %524 = vst.msk [vmem:[#allocation2] sm:$0xff] %vm423_vm0, %v523_v42 }
  0x5d   : > { %1180 = vmatpush3.msra.mxu0 %v789_v45 }
  0x5e   : > { %1181 = vmatprep.subr.mxu0 %v1338_v0 }
  0x5f   : > { %1182 = vmatpush3.msra.mxu0 %v788_v46 }
  0x60   : > { %1183 = vmatprep.subr.mxu0 %v1338_v0 }
  0x61   : > { %1184 = vmatpush3.msra.mxu0 %v787_v47 }
  0x62   : > { %1185 = vmatprep.subr.mxu0 %v1338_v0 }
  0x63   : > { %v619_v43 = vld [vmem:[#allocation2] sm:$0xff]  ;;  %1186 = vmatpush3.msra.mxu0 %v786_v48 }
  0x64   : > { %v620_v44 = vmul.f32 0.125, %v619_v43 }
  0x66   : > { %1169 = vmatmul.mubr.msk.f32.vlgmr.msra.gmra.mxu1 %vm423_vm0, %v620_v44 }
  0x67   : > { %1198 = vmatprep.mubr.msk.f32.mxu1 %vm1339_vm1, %v1338_v0  ;;  %1191 = vmatpush3.msra.mxu1 %v879_v49 }
  0x68   : > { %1192 = vmatprep.subr.mxu1 %v1338_v0 }
  0x69   : > { %1193 = vmatpush3.msra.mxu1 %v878_v58 }
  0x6a   : > { %1194 = vmatprep.subr.mxu1 %v1338_v0 }
  0x6b   : > { %1195 = vmatpush3.msra.mxu1 %v877_v59 }
  0x6c   : > { %1196 = vmatprep.subr.mxu1 %v1338_v0  ;;  %v1083_v0 = vld [vmem:[%s1609_s8] ss:$0 sm:$0xff] }
  0x6d   : > { %1197 = vmatpush3.msra.mxu1 %v876_v60 }
 0x114   : > { %v700_v50 = vpop.f32.mrf.mxu0 }
 0x116   : > { %v1159_v51 = vpop.f32.mrf.mxu0 }
 0x126   : > { %v773_v52 = vpop.f32.mrf.mxu1 }
 0x127   : > { %v774_v54 = vadd.f32 %v773_v52, %v700_v50 }
 0x128   : > { %v1170_v55 = vpop.f32.mrf.mxu1 }
 0x129   : > { %v784_v56 = vadd.f32 %v1080_v53, %v774_v54 }
 0x12b   : > { %v785_v57 = vmax.f32 %v784_v56, 0.0 }
 0x12d   : > { %1188 = vmatmul.mubr.msk.f32.vlgmr.msra.gmra.mxu0 %vm801_vm9, %v785_v57 }
 0x1ed   : > { %v871_v62 = vpop.f32.mrf.mxu0 }
 0x1ee   : > { %v872_v63 = vadd.f32 %v1081_v61, %v871_v62 }
 0x1ef   : > { %v1189_v1 = vpop.f32.mrf.mxu0 }
 0x1f0   : > { %v875_v2 = vmax.f32 %v872_v63, 0.0 }
 0x1f2   : > { %1199 = vmatmul.mubr.msk.f32.vlgmr.msra.gmra.mxu1 %vm423_vm0, %v875_v2 }
 0x2b2   : > { %v956_v3 = vpop.f32.mrf.mxu1 }
 0x2b3   : > { %v957_v4 = vadd.f32 %v1083_v0, %v956_v3 }
 0x2b4   : > { %v1200_v5 = vpop.f32.mrf.mxu1 }
 0x2b5   : > { %961 = vst.msk [vmem:[%s418_s19] sm:$0xff] %vm960_vm10, %v957_v4 }
 0x2b6 PF: > { %s21_s11 = sadd.s32 1, %s1332_s11   ;;  %s1614_s30 = smov %s1328_s10 }
 0x2b7   : > { %p18_p6 = scmp.ge.s32.totalorder %s21_s11, 4   ;;  %s1615_s10 = smov %s1617_s13 }
 0x2b9   :  { %20 = sbr.rel (!%p18_p6) target bundleno = 3 (0x3), region = 106 }
 0x2be   :  { %981 = vsyncpa [#allocation5], 1 }
 0x2bf   :  { %983 = vsyncpa [#allocation5 + $0x1], 1 }
 0x2c0   :  { %984 = vsyncpa [#allocation7], 1 }

</bundles_post_ra>
